<compile_context>
chip_gen: v7x
topology: tpu7x:2x2x1
jax: 0.10.0
libtpu: 0.0.40
codegen_flags: <defaults>
</compile_context>

<pallas_src>
import jax
import jax.numpy as jnp
from jax.experimental import pallas as pl
from jax.experimental.pallas import tpu as pltpu

IN_DIM = 28 * 28          # 784 (divisible by 8 -> valid sublane dim for w1)
H1 = 512
H2 = 256
OUT_DIM = 10
OUT_PAD = 128             # lane-dense output tile (no masked partial stores)

MAX_BATCH_TILE = 512      # rows per grid step; sweepable


def _round_up(n, m):
    return ((n + m - 1) // m) * m


def mlp_kernel(x_ref, w1_ref, b1_ref, w2_ref, b2_ref, w3_ref, b3_ref, o_ref):
    """Fused fc1+ReLU+fc2+ReLU+fc3 for one batch tile.

    x arrives as f32 straight from HBM; the bf16 cast happens here (free VPU
    slots under the MXU) instead of as a separate pad/cast pass in the wrapper.
    All matmuls: bf16 MXU inputs, f32 accumulation. Bias add + ReLU in f32.
    """
    x = x_ref[...].astype(jnp.bfloat16)                                    # [tm, 784] bf16
    h1 = jnp.dot(x, w1_ref[...], preferred_element_type=jnp.float32) + b1_ref[...]
    h1 = jnp.maximum(h1, 0.0).astype(jnp.bfloat16)                         # [tm, 512]
    h2 = jnp.dot(h1, w2_ref[...], preferred_element_type=jnp.float32) + b2_ref[...]
    h2 = jnp.maximum(h2, 0.0).astype(jnp.bfloat16)                         # [tm, 256]
    out = jnp.dot(h2, w3_ref[...], preferred_element_type=jnp.float32) + b3_ref[...]
    o_ref[...] = out.astype(o_ref.dtype)                                   # f32 [tm, 128]


def pack_params(params):
    """One-time cast of logical f32 [in, out] params into kernel layout.
    Weights -> bf16 (w3 zero-padded to 128 output lanes), biases stay f32."""
    w1, b1, w2, b2, w3, b3 = params
    w1p = w1.astype(jnp.bfloat16)                                            # [784, 512]
    w2p = w2.astype(jnp.bfloat16)                                            # [512, 256]
    w3p = jnp.pad(w3, ((0, 0), (0, OUT_PAD - OUT_DIM))).astype(jnp.bfloat16) # [256, 128]
    b3p = jnp.pad(b3, ((0, 0), (0, OUT_PAD - OUT_DIM))).astype(jnp.float32)  # [1, 128]
    return (w1p, b1.astype(jnp.float32), w2p, b2.astype(jnp.float32), w3p, b3p)


def mlp_forward(x, packed_params, *, batch_tile=None):
    """x: [B, 1, 28, 28] or [B, 784] float32. Returns [B, 10] float32."""
    w1, b1, w2, b2, w3, b3 = packed_params
    x2d = x.reshape(-1, IN_DIM)                       # x.view(-1, 28*28): pure reshape, no HBM pass
    B = x2d.shape[0]

    if batch_tile is None:
        if B <= 16:
            # tiny batches: one sublane-aligned tile
            batch_tile = _round_up(B, 8)
        else:
            # >=2 grid steps so both v7x TensorCores get work; cap per-step rows
            batch_tile = min(MAX_BATCH_TILE, _round_up(pl.cdiv(B, 2), 8))
    batch_tile = max(8, _round_up(batch_tile, 8))     # sublane (8) alignment
    grid = (pl.cdiv(B, batch_tile),)                  # ragged last block: OOB writes masked

    full = lambda i: (0, 0)
    out = pl.pallas_call(
        mlp_kernel,
        out_shape=jax.ShapeDtypeStruct((B, OUT_PAD), jnp.float32),
        grid_spec=pltpu.PrefetchScalarGridSpec(
            num_scalar_prefetch=0,
            grid=grid,
            in_specs=[
                pl.BlockSpec((batch_tile, IN_DIM), lambda i: (i, 0)),  # x tile (f32, cast in-kernel)
                pl.BlockSpec((IN_DIM, H1), full),                      # w1 (bf16)
                pl.BlockSpec((1, H1), full),                           # b1 (f32)
                pl.BlockSpec((H1, H2), full),                          # w2 (bf16)
                pl.BlockSpec((1, H2), full),                           # b2 (f32)
                pl.BlockSpec((H2, OUT_PAD), full),                     # w3 (bf16)
                pl.BlockSpec((1, OUT_PAD), full),                      # b3 (f32)
            ],
            out_specs=pl.BlockSpec((batch_tile, OUT_PAD), lambda i: (i, 0)),
        ),
        compiler_params=pltpu.CompilerParams(
            dimension_semantics=("parallel",),        # batch axis shards across TCs (v7x)
        ),
    )(x2d, w1, b1, w2, b2, w3, b3)

    return out[:, :OUT_DIM]                           # drop output-lane padding


def init_params(key):
    """Matches MLP.init_weights(): weight ~ N(0, 0.1), bias = 0.
    Stored as [in, out] (transpose of PyTorch's [out, in])."""
    k1, k2, k3 = jax.random.split(key, 3)
    w1 = 0.1 * jax.random.normal(k1, (IN_DIM, H1), jnp.float32)
    b1 = jnp.zeros((1, H1), jnp.float32)
    w2 = 0.1 * jax.random.normal(k2, (H1, H2), jnp.float32)
    b2 = jnp.zeros((1, H2), jnp.float32)
    w3 = 0.1 * jax.random.normal(k3, (H2, OUT_DIM), jnp.float32)
    b3 = jnp.zeros((1, OUT_DIM), jnp.float32)
    return (w1, b1, w2, b2, w3, b3)


def mlp_reference_f32(x, params):
    """Pure-f32 pure-JAX reference (module semantics)."""
    w1, b1, w2, b2, w3, b3 = params
    x2d = x.reshape(-1, IN_DIM)
    h1 = jnp.maximum(x2d @ w1 + b1, 0.0)
    h2 = jnp.maximum(h1 @ w2 + b2, 0.0)
    return h2 @ w3 + b3


def mlp_reference_bf16(x, params):
    """Reference with the kernel's dtype recipe (bf16 MXU inputs, f32 accumulation)."""
    w1, b1, w2, b2, w3, b3 = params
    bf = jnp.bfloat16

    def mm(a, w):
        return jnp.dot(a.astype(bf), w.astype(bf), preferred_element_type=jnp.float32)

    x2d = x.reshape(-1, IN_DIM)
    h1 = jnp.maximum(mm(x2d, w1) + b1, 0.0)
    h2 = jnp.maximum(mm(h1, w2) + b2, 0.0)
    return mm(h2, w3) + b3


if __name__ == "__main__":
    key = jax.random.PRNGKey(0)
    pkey, xkey = jax.random.split(key)
    params = init_params(pkey)
    packed = pack_params(params)

    # Small MNIST-like batch: [B, 1, 28, 28]
    B = 8
    x = jax.random.normal(xkey, (B, 1, 28, 28), jnp.float32)

    out = mlp_forward(x, packed)
    out = jax.block_until_ready(out)
    assert out.shape == (B, OUT_DIM)

    # Tight check against a reference using the same bf16-in / f32-accumulate recipe.
    ref_bf16 = mlp_reference_bf16(x, params)
    assert jnp.allclose(out, ref_bf16, atol=5e-3, rtol=5e-3), "mismatch vs bf16-matched reference"

    # Loose check against the pure-f32 module semantics (bf16 rounding tolerance).
    ref_f32 = mlp_reference_f32(x, params)
    assert jnp.allclose(out, ref_f32, atol=2e-1, rtol=5e-2), "mismatch vs f32 reference"

    print("KERNEL_OK")
</pallas_src>

<mosaic_0001>
module attributes {stable_mosaic.version = 11 : i64} {
  func.func @mlp_kernel(%arg0: i32, %arg1: memref<8x784xf32, #tpu.memory_space<vmem>>, %arg2: memref<784x512xbf16, #tpu.memory_space<vmem>>, %arg3: memref<1x512xf32, #tpu.memory_space<vmem>>, %arg4: memref<512x256xbf16, #tpu.memory_space<vmem>>, %arg5: memref<1x256xf32, #tpu.memory_space<vmem>>, %arg6: memref<256x128xbf16, #tpu.memory_space<vmem>>, %arg7: memref<1x128xf32, #tpu.memory_space<vmem>>, %arg8: memref<8x128xf32, #tpu.memory_space<vmem>>) attributes {dimension_semantics = [#tpu.dimension_semantics<parallel>], iteration_bounds = array<i64: 1>, scalar_prefetch = 0 : i64, scratch_operands = 0 : i64, tpu.core_type = #tpu.core_type<tc>, window_params = [{transform_indices = @transform_0, window_bounds = array<i64: 8, 784>}, {pipeline_mode = #tpu.pipeline_mode<synchronous>, transform_indices = @transform_1, window_bounds = array<i64: 784, 512>}, {pipeline_mode = #tpu.pipeline_mode<synchronous>, transform_indices = @transform_2, window_bounds = array<i64: 1, 512>}, {pipeline_mode = #tpu.pipeline_mode<synchronous>, transform_indices = @transform_3, window_bounds = array<i64: 512, 256>}, {pipeline_mode = #tpu.pipeline_mode<synchronous>, transform_indices = @transform_4, window_bounds = array<i64: 1, 256>}, {pipeline_mode = #tpu.pipeline_mode<synchronous>, transform_indices = @transform_5, window_bounds = array<i64: 256, 128>}, {pipeline_mode = #tpu.pipeline_mode<synchronous>, transform_indices = @transform_6, window_bounds = array<i64: 1, 128>}, {transform_indices = @transform_7, window_bounds = array<i64: 8, 128>}]} {
    %c0 = arith.constant 0 : index
    %c0_0 = arith.constant 0 : index
    %0 = vector.load %arg1[%c0, %c0_0] : memref<8x784xf32, #tpu.memory_space<vmem>>, vector<8x784xf32>
    %1 = arith.truncf %0 : vector<8x784xf32> to vector<8x784xbf16>
    %c0_1 = arith.constant 0 : index
    %c0_2 = arith.constant 0 : index
    %2 = vector.load %arg2[%c0_1, %c0_2] : memref<784x512xbf16, #tpu.memory_space<vmem>>, vector<784x512xbf16>
    %cst = arith.constant dense<0.000000e+00> : vector<8x512xf32>
    %3 = tpu.matmul %1, %2, %cst {dimension_numbers = #tpu.dot_dimension_numbers<[1], [0], [0], [1], [0, 0, 1, 1], [], []>} : vector<8x784xbf16>, vector<784x512xbf16>, vector<8x512xf32> -> vector<8x512xf32>
    %c0_3 = arith.constant 0 : index
    %c0_4 = arith.constant 0 : index
    %4 = vector.load %arg3[%c0_3, %c0_4] : memref<1x512xf32, #tpu.memory_space<vmem>>, vector<1x512xf32>
    %5 = vector.broadcast %4 : vector<1x512xf32> to vector<8x512xf32>
    %6 = arith.addf %3, %5 : vector<8x512xf32>
    %cst_5 = arith.constant 0.000000e+00 : f32
    %7 = vector.broadcast %cst_5 : f32 to vector<8x512xf32>
    %8 = arith.maximumf %6, %7 : vector<8x512xf32>
    %9 = arith.truncf %8 : vector<8x512xf32> to vector<8x512xbf16>
    %c0_6 = arith.constant 0 : index
    %c0_7 = arith.constant 0 : index
    %10 = vector.load %arg4[%c0_6, %c0_7] : memref<512x256xbf16, #tpu.memory_space<vmem>>, vector<512x256xbf16>
    %cst_8 = arith.constant dense<0.000000e+00> : vector<8x256xf32>
    %11 = tpu.matmul %9, %10, %cst_8 {dimension_numbers = #tpu.dot_dimension_numbers<[1], [0], [0], [1], [0, 0, 1, 1], [], []>} : vector<8x512xbf16>, vector<512x256xbf16>, vector<8x256xf32> -> vector<8x256xf32>
    %c0_9 = arith.constant 0 : index
    %c0_10 = arith.constant 0 : index
    %12 = vector.load %arg5[%c0_9, %c0_10] : memref<1x256xf32, #tpu.memory_space<vmem>>, vector<1x256xf32>
    %13 = vector.broadcast %12 : vector<1x256xf32> to vector<8x256xf32>
    %14 = arith.addf %11, %13 : vector<8x256xf32>
    %cst_11 = arith.constant 0.000000e+00 : f32
    %15 = vector.broadcast %cst_11 : f32 to vector<8x256xf32>
    %16 = arith.maximumf %14, %15 : vector<8x256xf32>
    %17 = arith.truncf %16 : vector<8x256xf32> to vector<8x256xbf16>
    %c0_12 = arith.constant 0 : index
    %c0_13 = arith.constant 0 : index
    %18 = vector.load %arg6[%c0_12, %c0_13] : memref<256x128xbf16, #tpu.memory_space<vmem>>, vector<256x128xbf16>
    %cst_14 = arith.constant dense<0.000000e+00> : vector<8x128xf32>
    %19 = tpu.matmul %17, %18, %cst_14 {dimension_numbers = #tpu.dot_dimension_numbers<[1], [0], [0], [1], [0, 0, 1, 1], [], []>} : vector<8x256xbf16>, vector<256x128xbf16>, vector<8x128xf32> -> vector<8x128xf32>
    %c0_15 = arith.constant 0 : index
    %c0_16 = arith.constant 0 : index
    %20 = vector.load %arg7[%c0_15, %c0_16] : memref<1x128xf32, #tpu.memory_space<vmem>>, vector<1x128xf32>
    %21 = vector.broadcast %20 : vector<1x128xf32> to vector<8x128xf32>
    %22 = arith.addf %19, %21 : vector<8x128xf32>
    %c0_17 = arith.constant 0 : index
    %c0_18 = arith.constant 0 : index
    %23 = vector.load %arg8[%c0_17, %c0_18] : memref<8x128xf32, #tpu.memory_space<vmem>>, vector<8x128xf32>
    tpu.vector_store %arg8[%c0_17, %c0_18], %22 {strides = array<i32>} : memref<8x128xf32, #tpu.memory_space<vmem>>, vector<8x128xf32>,
    return
  }
  func.func @transform_0(%arg0: i32) -> (i32, i32) {
    %c0_i32 = arith.constant 0 : i32
    %c0_i32_0 = arith.constant 0 : i32
    return %arg0, %c0_i32 : i32, i32
  }
  func.func @transform_1(%arg0: i32) -> (i32, i32) {
    %c0_i32 = arith.constant 0 : i32
    %c0_i32_0 = arith.constant 0 : i32
    %c0_i32_1 = arith.constant 0 : i32
    return %c0_i32, %c0_i32_0 : i32, i32
  }
  func.func @transform_2(%arg0: i32) -> (i32, i32) {
    %c0_i32 = arith.constant 0 : i32
    %c0_i32_0 = arith.constant 0 : i32
    %c0_i32_1 = arith.constant 0 : i32
    return %c0_i32, %c0_i32_0 : i32, i32
  }
  func.func @transform_3(%arg0: i32) -> (i32, i32) {
    %c0_i32 = arith.constant 0 : i32
    %c0_i32_0 = arith.constant 0 : i32
    %c0_i32_1 = arith.constant 0 : i32
    return %c0_i32, %c0_i32_0 : i32, i32
  }
  func.func @transform_4(%arg0: i32) -> (i32, i32) {
    %c0_i32 = arith.constant 0 : i32
    %c0_i32_0 = arith.constant 0 : i32
    %c0_i32_1 = arith.constant 0 : i32
    return %c0_i32, %c0_i32_0 : i32, i32
  }
  func.func @transform_5(%arg0: i32) -> (i32, i32) {
    %c0_i32 = arith.constant 0 : i32
    %c0_i32_0 = arith.constant 0 : i32
    %c0_i32_1 = arith.constant 0 : i32
    return %c0_i32, %c0_i32_0 : i32, i32
  }
  func.func @transform_6(%arg0: i32) -> (i32, i32) {
    %c0_i32 = arith.constant 0 : i32
    %c0_i32_0 = arith.constant 0 : i32
    %c0_i32_1 = arith.constant 0 : i32
    return %c0_i32, %c0_i32_0 : i32, i32
  }
  func.func @transform_7(%arg0: i32) -> (i32, i32) {
    %c0_i32 = arith.constant 0 : i32
    %c0_i32_0 = arith.constant 0 : i32
    return %arg0, %c0_i32 : i32, i32
  }
}

</mosaic_0001>

<bundles_post_ra>
// kernel: tpu_custom_call.1
= control target key start
LH: loop header
LB: loop body
LE: loop exit
PB: predicated region body
PF: predicated region fallthrough
CT: control target
= control target key end

     0   :  { %12 = vsyncpa [#allocation3], 0  ;;  %s3346_s0 = inlined_call_operand.hbm [shape: f32[8,784], index: 0, kind: input, shape index: {}]   ;;  %s3347_s1 = inlined_call_operand.hbm [shape: bf16[784,512], index: 1, kind: input, shape index: {}]   ;;  %s3348_s2 = inlined_call_operand.vmem [shape: f32[1,512], index: 2, kind: input, shape index: {}]   ;;  %s3349_s3 = inlined_call_operand.hbm [shape: bf16[512,256], index: 3, kind: input, shape index: {}]   ;;  %s3350_s4 = inlined_call_operand.vmem [shape: f32[1,256], index: 4, kind: input, shape index: {}]   ;;  %s3351_s5 = inlined_call_operand.hbm [shape: bf16[256,128], index: 5, kind: input, shape index: {}]   ;;  %s3352_s6 = inlined_call_operand.vmem [shape: f32[1,128], index: 6, kind: input, shape index: {}]   ;;  %s3353_s7 = inlined_call_operand.hbm [shape: f32[8,128], index: 7, kind: output, shape index: {}]  }
   0x1   :  { %13 = vsyncpa [#allocation6], 0 }
   0x2   :  { %14 = vsyncpa [#allocation9], 0 }
   0x3   :  { %15 = vsyncpa [#allocation4], 0  ;;  %s3175_s24 = smov [#allocation5]   ;;  %s3057_s28 = scalar_lea.hbm %s3347_s1, 25088 }
   0x4   :  { %s31_s25 = sshll.u32 %s3175_s24, 4  ;;  %p3058_p0 = scmp.ne.s32.totalorder %s3347_s1, %s3057_s28  ;;  %s32_s25 = int_to_ptr.vmem [resolvable:$true] %s31_s25 }
   0x5   :  { %p3061_p1 = scmp.lt.u32.totalorder %s3057_s28, %s3347_s1 }
   0x7   :  { %p3063_p2 = pnand %p3061_p1, %p3058_p0 }
   0x9   :  { %3066 = shalt.err (!%p3063_p2)
}
   0xa   :  { %s3067_s10 = scalar_lea.vmem %s32_s25, 25088  ;;  %p3072_p4 = scmp.lt.s32.totalorder %s32_s25, %s32_s25 }
   0xb   :  { %p3068_p3 = scmp.ne.s32.totalorder %s32_s25, %s3067_s10  ;;  %p3073_p5 = scmp.lt.s32.totalorder %s3067_s10, %s3067_s10 }
   0xd   :  { %p3074_p6 = por %p3073_p5, %p3072_p4 }
   0xf   :  { %p3075_p7 = pnand %p3074_p6, %p3068_p3 }
  0x11   :  { %3078 = shalt.err (!%p3075_p7)
}
  0x12   :  { %s3176_s11 = smov 256   ;;  %s3177_s12 = smov 16  }
  0x13   :  { %37 = dma.hbm_to_vmem [thread:$0]  %s3347_s1, 25088, %s32_s25, [#allocation6], %s3176_s11, %s3176_s11, %s3177_s12  }
  0x14   :  { %s3178_s15 = smov [#allocation2]   ;;  %s3179_s17 = smov [#allocation7]  }
  0x15   :  { %s22_s16 = sshll.u32 %s3178_s15, 4  ;;  %s45_s18 = sshll.u32 %s3179_s17, 4  ;;  %s23_s16 = int_to_ptr.vmem [resolvable:$true] %s22_s16  ;;  %s46_s18 = int_to_ptr.vmem [resolvable:$true] %s45_s18 }
  0x16   :  { %s3079_s21 = scalar_lea.hbm %s3346_s0, 896 }
  0x17   :  { %p3080_p8 = scmp.ne.s32.totalorder %s3346_s0, %s3079_s21  ;;  %p3083_p9 = scmp.lt.u32.totalorder %s3079_s21, %s3346_s0 }
  0x19   :  { %p3085_p10 = pnand %p3083_p9, %p3080_p8 }
  0x1b   :  { %3088 = shalt.err (!%p3085_p10)
}
  0x1c   :  { %s3089_s1 = scalar_lea.vmem %s23_s16, 896  ;;  %p3094_p12 = scmp.lt.s32.totalorder %s23_s16, %s23_s16 }
  0x1d   :  { %p3090_p11 = scmp.ne.s32.totalorder %s23_s16, %s3089_s1  ;;  %p3095_p13 = scmp.lt.s32.totalorder %s3089_s1, %s3089_s1 }
  0x1f   :  { %p3096_p0 = por %p3095_p13, %p3094_p12 }
  0x21   :  { %p3097_p1 = pnand %p3096_p0, %p3090_p11 }
  0x23   :  { %3100 = shalt.err (!%p3097_p1)
}
  0x24   :  { %25 = dma.hbm_to_vmem [thread:$0]  %s3346_s0, 896, %s23_s16, [#allocation3]  }
  0x25   :  { %s3101_s30 = scalar_lea.hbm %s3349_s3, 8192 }
  0x26   :  { %p3102_p2 = scmp.ne.s32.totalorder %s3349_s3, %s3101_s30  ;;  %p3105_p3 = scmp.lt.u32.totalorder %s3101_s30, %s3349_s3 }
  0x28   :  { %p3107_p4 = pnand %p3105_p3, %p3102_p2 }
  0x2a   :  { %3110 = shalt.err (!%p3107_p4)
}
  0x2b   :  { %s3111_s12 = scalar_lea.vmem %s46_s18, 8192  ;;  %p3116_p6 = scmp.lt.s32.totalorder %s46_s18, %s46_s18 }
  0x2c   :  { %p3112_p5 = scmp.ne.s32.totalorder %s46_s18, %s3111_s12  ;;  %p3117_p7 = scmp.lt.s32.totalorder %s3111_s12, %s3111_s12 }
  0x2e   :  { %p3118_p8 = por %p3117_p7, %p3116_p6 }
  0x30   :  { %p3119_p9 = pnand %p3118_p8, %p3112_p5 }
  0x32   :  { %3122 = shalt.err (!%p3119_p9)
}
  0x33   :  { %s3180_s0 = smov 128   ;;  %s3181_s13 = smov 8  }
  0x34   :  { %51 = dma.hbm_to_vmem [thread:$0]  %s3349_s3, 8192, %s46_s18, [#allocation6], %s3180_s0, %s3180_s0, %s3181_s13  }
  0x35   :  { %s3182_s16 = smov [#allocation8]   ;;  %s3123_s21 = scalar_lea.hbm %s3351_s5, 2048 }
  0x36   :  { %s59_s17 = sshll.u32 %s3182_s16, 4  ;;  %p3124_p10 = scmp.ne.s32.totalorder %s3351_s5, %s3123_s21  ;;  %s60_s17 = int_to_ptr.vmem [resolvable:$true] %s59_s17 }
  0x37   :  { %p3127_p11 = scmp.lt.u32.totalorder %s3123_s21, %s3351_s5 }
  0x39   :  { %p3129_p12 = pnand %p3127_p11, %p3124_p10 }
  0x3b   :  { %3132 = shalt.err (!%p3129_p12)
}
  0x3c   :  { %s3133_s1 = scalar_lea.vmem %s60_s17, 2048  ;;  %p3138_p0 = scmp.lt.s32.totalorder %s60_s17, %s60_s17 }
  0x3d   :  { %p3134_p13 = scmp.ne.s32.totalorder %s60_s17, %s3133_s1  ;;  %p3139_p1 = scmp.lt.s32.totalorder %s3133_s1, %s3133_s1 }
  0x3f   :  { %p3140_p2 = por %p3139_p1, %p3138_p0 }
  0x41   :  { %p3141_p3 = pnand %p3140_p2, %p3134_p13 }
  0x43   :  { %3144 = shalt.err (!%p3141_p3)
}
  0x44   :  { %s3183_s3 = smov 64   ;;  %s3184_s18 = smov 4  }
  0x45   :  { %65 = dma.hbm_to_vmem [thread:$0]  %s3351_s5, 2048, %s60_s17, [#allocation9], %s3183_s3, %s3183_s3, %s3184_s18  }
  0x46   :  { %3167 = dma.done.wait [#allocation3], 896  }
  0x47   :  { %3168 = vsyncadd [#allocation3], 4294966400 }
  0x48   :  { %3169 = dma.done.wait [#allocation6], 33280  }
  0x49   :  { %3170 = vsyncadd [#allocation6], 4294934016 }
  0x4a   :  { %3171 = dma.done.wait [#allocation9], 2048  }
  0x4b   :  { %3172 = vsyncadd [#allocation9], 4294965248  ;;  %v2651_v0 = vld [vmem:[#allocation5 + $0x4] ss:$16 sps:$4 sm:$0xff]   ;;  %v2655_v2 = vld [vmem:[#allocation5] ss:$16 sps:$4 sm:$0xff]  }
  0x4c   :  { %v2653_v1 = vld [vmem:[#allocation5 + $0x204] ss:$16 sps:$4 sm:$0xff]   ;;  %1297 = vmatprep.subr.bf16.mxu1 %v2651_v0  ;;  %v2656_v3 = vld [vmem:[#allocation5 + $0x200] ss:$16 sps:$4 sm:$0xff]   ;;  %vm1293_vm0 = vcmask 130048   ;;  %s3186_s8 = smov [#allocation10]  }
  0x4d   :  { %1338 = vmatprep.subr.bf16.mxu0 %v2653_v1  ;;  %v2657_v4 = vld [vmem:[#allocation5 + $0x24] ss:$16 sps:$4 sm:$0xff]   ;;  %1298 = vmatpush1.bf16.msra.mxu1 %v2655_v2  ;;  %v2661_v6 = vld [vmem:[#allocation5 + $0x20] ss:$16 sps:$4 sm:$0xff]   ;;  %s2297_s9 = sshll.u32 %s3186_s8, 4  ;;  %s2298_s9 = int_to_ptr.vmem [resolvable:$true] %s2297_s9 }
  0x4e   :  { %1339 = vmatpush1.bf16.msra.mxu0 %v2656_v3  ;;  %v2659_v5 = vld [vmem:[#allocation5 + $0x224] ss:$16 sps:$4 sm:$0xff]   ;;  %1299 = vmatprep.subr.bf16.mxu1 %v2657_v4  ;;  %v2662_v7 = vld [vmem:[#allocation5 + $0x220] ss:$16 sps:$4 sm:$0xff]   ;;  %v81_v4 = vld [vmem:[#allocation2] sm:$0xff]  ;;  %s3145_s10 = scalar_lea.vmem %s2298_s9, 128  ;;  %p3150_p5 = scmp.lt.s32.totalorder %s2298_s9, %s2298_s9 }
  0x4f   :  { %1340 = vmatprep.subr.bf16.mxu0 %v2659_v5  ;;  %v2663_v8 = vld [vmem:[#allocation5 + $0x44] ss:$16 sps:$4 sm:$0xff]   ;;  %v2667_v10 = vld [vmem:[#allocation5 + $0x40] ss:$16 sps:$4 sm:$0xff]   ;;  %p3146_p4 = scmp.ne.s32.totalorder %s2298_s9, %s3145_s10  ;;  %p3151_p6 = scmp.lt.s32.totalorder %s3145_s10, %s3145_s10 }
  0x50   :  { %v2665_v9 = vld [vmem:[#allocation5 + $0x244] ss:$16 sps:$4 sm:$0xff]   ;;  %v2668_v11 = vld [vmem:[#allocation5 + $0x240] ss:$16 sps:$4 sm:$0xff]  }
  0x51   :  { %1300 = vmatpush1.bf16.msra.mxu1 %v2661_v6  ;;  %v2669_v12 = vld [vmem:[#allocation5 + $0x64] ss:$16 sps:$4 sm:$0xff]   ;;  %v2673_v14 = vld [vmem:[#allocation5 + $0x60] ss:$16 sps:$4 sm:$0xff]   ;;  %v83_v6 = vld [vmem:[#allocation2 + $0x10] sm:$0xff]  ;;  %p3152_p7 = por %p3151_p6, %p3150_p5 }
  0x52   :  { %1341 = vmatpush1.bf16.msra.mxu0 %v2662_v7  ;;  %1301 = vmatprep.subr.bf16.mxu1 %v2663_v8  ;;  %v2671_v13 = vld [vmem:[#allocation5 + $0x264] ss:$16 sps:$4 sm:$0xff]   ;;  %v2674_v15 = vld [vmem:[#allocation5 + $0x260] ss:$16 sps:$4 sm:$0xff]   ;;  %v2752_v7 = vld [vmem:[#allocation5 + $0xc] ss:$16 sps:$4 sm:$0xff]   ;;  %v3281_v8 = vpack.c.bf16 %v81_v4, %v81_v4 }
  0x53   :  { %1342 = vmatprep.subr.bf16.mxu0 %v2665_v9  ;;  %v2675_v16 = vld [vmem:[#allocation5 + $0x84] ss:$16 sps:$4 sm:$0xff]   ;;  %v2679_v18 = vld [vmem:[#allocation5 + $0x80] ss:$16 sps:$4 sm:$0xff]   ;;  %v2836_v4 = vld [vmem:[#allocation5 + $0x1cc] ss:$16 sps:$4 sm:$0xff]   ;;  %p3153_p8 = pnand %p3152_p7, %p3146_p4 }
  0x54   :  { %v2677_v17 = vld [vmem:[#allocation5 + $0x284] ss:$16 sps:$4 sm:$0xff]   ;;  %v2680_v19 = vld [vmem:[#allocation5 + $0x280] ss:$16 sps:$4 sm:$0xff]  }
  0x55   :  { %1302 = vmatpush1.bf16.msra.mxu1 %v2667_v10  ;;  %v2681_v20 = vld [vmem:[#allocation5 + $0xa4] ss:$16 sps:$4 sm:$0xff]   ;;  %v2685_v22 = vld [vmem:[#allocation5 + $0xa0] ss:$16 sps:$4 sm:$0xff]   ;;  %v2750_v10 = vld [vmem:[#allocation5 + $0x8] ss:$16 sps:$4 sm:$0xff]  }
  0x56   :  { %1343 = vmatpush1.bf16.msra.mxu0 %v2668_v11  ;;  %1303 = vmatprep.subr.bf16.mxu1 %v2669_v12  ;;  %v2683_v21 = vld [vmem:[#allocation5 + $0x2a4] ss:$16 sps:$4 sm:$0xff]   ;;  %v2686_v23 = vld [vmem:[#allocation5 + $0x2a0] ss:$16 sps:$4 sm:$0xff]   ;;  %v3283_v11 = vpack.c.bf16 %v83_v6, %v83_v6  ;;  %v2834_v6 = vld [vmem:[#allocation5 + $0x1c8] ss:$16 sps:$4 sm:$0xff]  }
  0x57   :  { %1344 = vmatprep.subr.bf16.mxu0 %v2671_v13  ;;  %v2687_v24 = vld [vmem:[#allocation5 + $0xc4] ss:$16 sps:$4 sm:$0xff]   ;;  %v2691_v26 = vld [vmem:[#allocation5 + $0xc0] ss:$16 sps:$4 sm:$0xff]   ;;  %v2758_v13 = vld [vmem:[#allocation5 + $0x2c] ss:$16 sps:$4 sm:$0xff]  }
  0x58   :  { %v2689_v25 = vld [vmem:[#allocation5 + $0x2c4] ss:$16 sps:$4 sm:$0xff]   ;;  %v2692_v27 = vld [vmem:[#allocation5 + $0x2c0] ss:$16 sps:$4 sm:$0xff]  }
  0x59   :  { %1304 = vmatpush1.bf16.msra.mxu1 %v2673_v14  ;;  %v2693_v28 = vld [vmem:[#allocation5 + $0xe4] ss:$16 sps:$4 sm:$0xff]   ;;  %v2697_v30 = vld [vmem:[#allocation5 + $0xe0] ss:$16 sps:$4 sm:$0xff]  }
  0x5a   :  { %1345 = vmatpush1.bf16.msra.mxu0 %v2674_v15  ;;  %1305 = vmatprep.subr.bf16.mxu1 %v2675_v16  ;;  %v2695_v29 = vld [vmem:[#allocation5 + $0x2e4] ss:$16 sps:$4 sm:$0xff]   ;;  %v2698_v31 = vld [vmem:[#allocation5 + $0x2e0] ss:$16 sps:$4 sm:$0xff]   ;;  %v2756_v15 = vld [vmem:[#allocation5 + $0x28] ss:$16 sps:$4 sm:$0xff]  }
  0x5b   :  { %1346 = vmatprep.subr.bf16.mxu0 %v2677_v17  ;;  %v2699_v32 = vld [vmem:[#allocation5 + $0x104] ss:$16 sps:$4 sm:$0xff]   ;;  %v2703_v34 = vld [vmem:[#allocation5 + $0x100] ss:$16 sps:$4 sm:$0xff]   ;;  %v2764_v17 = vld [vmem:[#allocation5 + $0x4c] ss:$16 sps:$4 sm:$0xff]  }
  0x5c   :  { %v2701_v33 = vld [vmem:[#allocation5 + $0x304] ss:$16 sps:$4 sm:$0xff]   ;;  %v2704_v35 = vld [vmem:[#allocation5 + $0x300] ss:$16 sps:$4 sm:$0xff]  }
  0x5d   :  { %1306 = vmatpush1.bf16.msra.mxu1 %v2679_v18  ;;  %v2705_v36 = vld [vmem:[#allocation5 + $0x124] ss:$16 sps:$4 sm:$0xff]   ;;  %v2709_v38 = vld [vmem:[#allocation5 + $0x120] ss:$16 sps:$4 sm:$0xff]  }
  0x5e   :  { %1347 = vmatpush1.bf16.msra.mxu0 %v2680_v19  ;;  %1307 = vmatprep.subr.bf16.mxu1 %v2681_v20  ;;  %v2707_v37 = vld [vmem:[#allocation5 + $0x324] ss:$16 sps:$4 sm:$0xff]   ;;  %v2710_v39 = vld [vmem:[#allocation5 + $0x320] ss:$16 sps:$4 sm:$0xff]   ;;  %v2762_v19 = vld [vmem:[#allocation5 + $0x48] ss:$16 sps:$4 sm:$0xff]  }
  0x5f   :  { %1348 = vmatprep.subr.bf16.mxu0 %v2683_v21  ;;  %v2711_v40 = vld [vmem:[#allocation5 + $0x144] ss:$16 sps:$4 sm:$0xff]   ;;  %v2715_v42 = vld [vmem:[#allocation5 + $0x140] ss:$16 sps:$4 sm:$0xff]   ;;  %v2770_v21 = vld [vmem:[#allocation5 + $0x6c] ss:$16 sps:$4 sm:$0xff]  }
  0x60   :  { %v2713_v41 = vld [vmem:[#allocation5 + $0x344] ss:$16 sps:$4 sm:$0xff]   ;;  %v2716_v43 = vld [vmem:[#allocation5 + $0x340] ss:$16 sps:$4 sm:$0xff]  }
  0x61   :  { %1308 = vmatpush1.bf16.msra.mxu1 %v2685_v22  ;;  %v2717_v44 = vld [vmem:[#allocation5 + $0x164] ss:$16 sps:$4 sm:$0xff]   ;;  %v2721_v47 = vld [vmem:[#allocation5 + $0x160] ss:$16 sps:$4 sm:$0xff]  }
  0x62   :  { %1349 = vmatpush1.bf16.msra.mxu0 %v2686_v23  ;;  %1309 = vmatprep.subr.bf16.mxu1 %v2687_v24  ;;  %v2719_v45 = vld [vmem:[#allocation5 + $0x364] ss:$16 sps:$4 sm:$0xff]   ;;  %v2722_v50 = vld [vmem:[#allocation5 + $0x360] ss:$16 sps:$4 sm:$0xff]   ;;  %v2768_v23 = vld [vmem:[#allocation5 + $0x68] ss:$16 sps:$4 sm:$0xff]  }
  0x63   :  { %1350 = vmatprep.subr.bf16.mxu0 %v2689_v25  ;;  %v82_v46 = vld [vmem:[#allocation2 + $0x8] sm:$0xff]  ;;  %v84_v49 = vld [vmem:[#allocation2 + $0x18] sm:$0xff]  ;;  %v2776_v25 = vld [vmem:[#allocation5 + $0x8c] ss:$16 sps:$4 sm:$0xff]  }
  0x64   :  { %v3275_v48 = vpack.c.bf16 %v82_v46, %v82_v46  ;;  %v2723_v51 = vld [vmem:[#allocation5 + $0x184] ss:$16 sps:$4 sm:$0xff]   ;;  %v3277_v52 = vpack.c.bf16 %v84_v49, %v84_v49  ;;  %v2727_v54 = vld [vmem:[#allocation5 + $0x180] ss:$16 sps:$4 sm:$0xff]   ;;  %v2804_v49 = vld [vmem:[#allocation5 + $0x128] ss:$16 sps:$4 sm:$0xff]  }
  0x65   :  { %1310 = vmatpush1.bf16.msra.mxu1 %v2691_v26  ;;  %v2725_v53 = vld [vmem:[#allocation5 + $0x384] ss:$16 sps:$4 sm:$0xff]   ;;  %v2728_v55 = vld [vmem:[#allocation5 + $0x380] ss:$16 sps:$4 sm:$0xff]  }
  0x66   :  { %1351 = vmatpush1.bf16.msra.mxu0 %v2692_v27  ;;  %1311 = vmatprep.subr.bf16.mxu1 %v2693_v28  ;;  %v2729_v56 = vld [vmem:[#allocation5 + $0x1a4] ss:$16 sps:$4 sm:$0xff]   ;;  %v2733_v58 = vld [vmem:[#allocation5 + $0x1a0] ss:$16 sps:$4 sm:$0xff]   ;;  %v2774_v27 = vld [vmem:[#allocation5 + $0x88] ss:$16 sps:$4 sm:$0xff]  }
  0x67   :  { %1352 = vmatprep.subr.bf16.mxu0 %v2695_v29  ;;  %1329 = vmatprep.mubr.bf16.mxu1 %v3275_v48  ;;  %v2731_v57 = vld [vmem:[#allocation5 + $0x3a4] ss:$16 sps:$4 sm:$0xff]   ;;  %v2734_v59 = vld [vmem:[#allocation5 + $0x3a0] ss:$16 sps:$4 sm:$0xff]   ;;  %v2782_v29 = vld [vmem:[#allocation5 + $0xac] ss:$16 sps:$4 sm:$0xff]  }
  0x68   :  { %1370 = vmatprep.mubr.bf16.mxu0 %v3277_v52  ;;  %v2735_v60 = vld [vmem:[#allocation5 + $0x1c4] ss:$16 sps:$4 sm:$0xff]   ;;  %v2739_v62 = vld [vmem:[#allocation5 + $0x1c0] ss:$16 sps:$4 sm:$0xff]  }
  0x69   :  { %1312 = vmatpush1.bf16.msra.mxu1 %v2697_v30  ;;  %v2737_v61 = vld [vmem:[#allocation5 + $0x3c4] ss:$16 sps:$4 sm:$0xff]   ;;  %v2740_v63 = vld [vmem:[#allocation5 + $0x3c0] ss:$16 sps:$4 sm:$0xff]  }
  0x6a   :  { %1353 = vmatpush1.bf16.msra.mxu0 %v2698_v31  ;;  %1313 = vmatprep.subr.bf16.mxu1 %v2699_v32  ;;  %v2741_v0 = vld [vmem:[#allocation5 + $0x1e4] ss:$16 sps:$4 sm:$0xff]   ;;  %v2745_v2 = vld [vmem:[#allocation5 + $0x1e0] ss:$16 sps:$4 sm:$0xff]   ;;  %v2780_v31 = vld [vmem:[#allocation5 + $0xa8] ss:$16 sps:$4 sm:$0xff]  }
  0x6b   :  { %1354 = vmatprep.subr.bf16.mxu0 %v2701_v33  ;;  %v2743_v1 = vld [vmem:[#allocation5 + $0x3e4] ss:$16 sps:$4 sm:$0xff]   ;;  %v2746_v3 = vld [vmem:[#allocation5 + $0x3e0] ss:$16 sps:$4 sm:$0xff]   ;;  %v2788_v33 = vld [vmem:[#allocation5 + $0xcc] ss:$16 sps:$4 sm:$0xff]  }
  0x6c   :  { %v2749_v5 = vld [vmem:[#allocation5 + $0x404] ss:$16 sps:$4 sm:$0xff]   ;;  %v2747_v9 = vld [vmem:[#allocation5 + $0x400] ss:$16 sps:$4 sm:$0xff]  }
  0x6d   :  { %1314 = vmatpush1.bf16.msra.mxu1 %v2703_v34  ;;  %v2755_v12 = vld [vmem:[#allocation5 + $0x424] ss:$16 sps:$4 sm:$0xff]   ;;  %v2753_v14 = vld [vmem:[#allocation5 + $0x420] ss:$16 sps:$4 sm:$0xff]  }
  0x6e   :  { %1355 = vmatpush1.bf16.msra.mxu0 %v2704_v35  ;;  %1315 = vmatprep.subr.bf16.mxu1 %v2705_v36  ;;  %v2761_v16 = vld [vmem:[#allocation5 + $0x444] ss:$16 sps:$4 sm:$0xff]   ;;  %v2759_v18 = vld [vmem:[#allocation5 + $0x440] ss:$16 sps:$4 sm:$0xff]  }
  0x6f   :  { %1356 = vmatprep.subr.bf16.mxu0 %v2707_v37  ;;  %v2767_v20 = vld [vmem:[#allocation5 + $0x464] ss:$16 sps:$4 sm:$0xff]   ;;  %v2765_v22 = vld [vmem:[#allocation5 + $0x460] ss:$16 sps:$4 sm:$0xff]   ;;  %v2786_v37 = vld [vmem:[#allocation5 + $0xc8] ss:$16 sps:$4 sm:$0xff]  }
  0x70   :  { %v2773_v24 = vld [vmem:[#allocation5 + $0x484] ss:$16 sps:$4 sm:$0xff]   ;;  %v2771_v26 = vld [vmem:[#allocation5 + $0x480] ss:$16 sps:$4 sm:$0xff]  }
  0x71   :  { %1316 = vmatpush1.bf16.msra.mxu1 %v2709_v38  ;;  %v2779_v28 = vld [vmem:[#allocation5 + $0x4a4] ss:$16 sps:$4 sm:$0xff]   ;;  %v2777_v30 = vld [vmem:[#allocation5 + $0x4a0] ss:$16 sps:$4 sm:$0xff]  }
  0x72   :  { %1357 = vmatpush1.bf16.msra.mxu0 %v2710_v39  ;;  %1317 = vmatprep.subr.bf16.mxu1 %v2711_v40  ;;  %v2785_v32 = vld [vmem:[#allocation5 + $0x4c4] ss:$16 sps:$4 sm:$0xff]   ;;  %v2783_v36 = vld [vmem:[#allocation5 + $0x4c0] ss:$16 sps:$4 sm:$0xff]   ;;  %v2794_v39 = vld [vmem:[#allocation5 + $0xec] ss:$16 sps:$4 sm:$0xff]  }
  0x73   :  { %1358 = vmatprep.subr.bf16.mxu0 %v2713_v41  ;;  %v86_v34 = vld [vmem:[#allocation2 + $0x28] sm:$0xff]  ;;  %v2792_v41 = vld [vmem:[#allocation5 + $0xe8] ss:$16 sps:$4 sm:$0xff]  }
  0x74   :  { %v3288_v35 = vpack.c.bf16 %v86_v34, %v86_v34  ;;  %v2791_v38 = vld [vmem:[#allocation5 + $0x4e4] ss:$16 sps:$4 sm:$0xff]   ;;  %v2789_v40 = vld [vmem:[#allocation5 + $0x4e0] ss:$16 sps:$4 sm:$0xff]   ;;  %v2869_v34 = vld [vmem:[#allocation5 + $0x2ec] ss:$16 sps:$4 sm:$0xff]  }
  0x75   :  { %1318 = vmatpush1.bf16.msra.mxu1 %v2715_v42  ;;  %v2797_v42 = vld [vmem:[#allocation5 + $0x504] ss:$16 sps:$4 sm:$0xff]  }
  0x76   :  { %1359 = vmatpush1.bf16.msra.mxu0 %v2716_v43  ;;  %1319 = vmatprep.subr.bf16.mxu1 %v2717_v44  ;;  %v2800_v43 = vld [vmem:[#allocation5 + $0x10c] ss:$16 sps:$4 sm:$0xff]   ;;  %v2795_v44 = vld [vmem:[#allocation5 + $0x500] ss:$16 sps:$4 sm:$0xff]   ;;  %v2803_v46 = vld [vmem:[#allocation5 + $0x524] ss:$16 sps:$4 sm:$0xff]  }
  0x77   :  { %1360 = vmatprep.subr.bf16.mxu0 %v2719_v45  ;;  %v2798_v45 = vld [vmem:[#allocation5 + $0x108] ss:$16 sps:$4 sm:$0xff]  }
  0x79   :  { %1320 = vmatpush1.bf16.msra.mxu1 %v2721_v47  ;;  %v2806_v47 = vld [vmem:[#allocation5 + $0x12c] ss:$16 sps:$4 sm:$0xff]  }
  0x7a   :  { %1361 = vmatpush1.bf16.msra.mxu0 %v2722_v50  ;;  %1321 = vmatprep.subr.bf16.mxu1 %v2723_v51  ;;  %v2809_v50 = vld [vmem:[#allocation5 + $0x544] ss:$16 sps:$4 sm:$0xff]   ;;  %v2812_v51 = vld [vmem:[#allocation5 + $0x14c] ss:$16 sps:$4 sm:$0xff]  }
  0x7b   :  { %1362 = vmatprep.subr.bf16.mxu0 %v2725_v53  ;;  %v2807_v53 = vld [vmem:[#allocation5 + $0x540] ss:$16 sps:$4 sm:$0xff]  }
  0x7d   :  { %1322 = vmatpush1.bf16.msra.mxu1 %v2727_v54  ;;  %v2810_v54 = vld [vmem:[#allocation5 + $0x148] ss:$16 sps:$4 sm:$0xff]  }
  0x7e   :  { %1363 = vmatpush1.bf16.msra.mxu0 %v2728_v55  ;;  %1323 = vmatprep.subr.bf16.mxu1 %v2729_v56  ;;  %v2815_v55 = vld [vmem:[#allocation5 + $0x564] ss:$16 sps:$4 sm:$0xff]   ;;  %v2818_v56 = vld [vmem:[#allocation5 + $0x16c] ss:$16 sps:$4 sm:$0xff]  }
  0x7f   :  { %1364 = vmatprep.subr.bf16.mxu0 %v2731_v57  ;;  %v2813_v57 = vld [vmem:[#allocation5 + $0x560] ss:$16 sps:$4 sm:$0xff]  }
  0x81   :  { %1324 = vmatpush1.bf16.msra.mxu1 %v2733_v58  ;;  %v2816_v58 = vld [vmem:[#allocation5 + $0x168] ss:$16 sps:$4 sm:$0xff]  }
  0x82   :  { %1365 = vmatpush1.bf16.msra.mxu0 %v2734_v59  ;;  %1325 = vmatprep.subr.bf16.mxu1 %v2735_v60  ;;  %v2821_v59 = vld [vmem:[#allocation5 + $0x584] ss:$16 sps:$4 sm:$0xff]   ;;  %v2824_v60 = vld [vmem:[#allocation5 + $0x18c] ss:$16 sps:$4 sm:$0xff]  }
  0x83   :  { %1366 = vmatprep.subr.bf16.mxu0 %v2737_v61  ;;  %v2819_v61 = vld [vmem:[#allocation5 + $0x580] ss:$16 sps:$4 sm:$0xff]  }
  0x85   :  { %1326 = vmatpush1.bf16.msra.mxu1 %v2739_v62  ;;  %v2822_v62 = vld [vmem:[#allocation5 + $0x188] ss:$16 sps:$4 sm:$0xff]  }
  0x86   :  { %1367 = vmatpush1.bf16.msra.mxu0 %v2740_v63  ;;  %1327 = vmatprep.subr.bf16.mxu1 %v2741_v0  ;;  %v2827_v63 = vld [vmem:[#allocation5 + $0x5a4] ss:$16 sps:$4 sm:$0xff]   ;;  %v2830_v0 = vld [vmem:[#allocation5 + $0x1ac] ss:$16 sps:$4 sm:$0xff]  }
  0x87   :  { %1368 = vmatprep.subr.bf16.mxu0 %v2743_v1  ;;  %v2825_v1 = vld [vmem:[#allocation5 + $0x5a0] ss:$16 sps:$4 sm:$0xff]  }
  0x89   :  { %1328 = vmatpush1.bf16.msra.mxu1 %v2745_v2  ;;  %v2828_v2 = vld [vmem:[#allocation5 + $0x1a8] ss:$16 sps:$4 sm:$0xff]  }
  0x8a   :  { %1369 = vmatpush1.bf16.msra.mxu0 %v2746_v3  ;;  %1461 = vmatprep.subr.bf16.mxu1 %v2752_v7  ;;  %v2833_v3 = vld [vmem:[#allocation5 + $0x5c4] ss:$16 sps:$4 sm:$0xff]  }
  0x8b   :  { %1379 = vmatprep.subr.bf16.mxu0 %v2749_v5  ;;  %v2831_v5 = vld [vmem:[#allocation5 + $0x5c0] ss:$16 sps:$4 sm:$0xff]   ;;  %v2839_v7 = vld [vmem:[#allocation5 + $0x5e4] ss:$16 sps:$4 sm:$0xff]  }
  0x8c   :  { %1330 = vmatmul.mubr.bf16.vlgmr.msra.gmra.mrb[0].mxu1 %v3281_v8 }
  0x8d   :  { %1371 = vmatmul.mubr.bf16.vlgmr.msra.gmra.mrb[0].mxu0 %v3283_v11  ;;  %1462 = vmatpush1.bf16.msra.mxu1 %v2750_v10  ;;  %v2837_v10 = vld [vmem:[#allocation5 + $0x5e0] ss:$16 sps:$4 sm:$0xff]  }
  0x8e   :  { %1380 = vmatpush1.bf16.msra.mxu0 %v2747_v9  ;;  %1463 = vmatprep.subr.bf16.mxu1 %v2758_v13  ;;  %v2842_v9 = vld [vmem:[#allocation5 + $0x1ec] ss:$16 sps:$4 sm:$0xff]  }
  0x8f   :  { %1381 = vmatprep.subr.bf16.mxu0 %v2755_v12  ;;  %1493 = vmatprep.mubr.bf16.mxu1 %v3275_v48  ;;  %v2801_v48 = vld [vmem:[#allocation5 + $0x520] ss:$16 sps:$4 sm:$0xff]   ;;  %v2840_v12 = vld [vmem:[#allocation5 + $0x1e8] ss:$16 sps:$4 sm:$0xff]  }
  0x90   :  { %1411 = vmatprep.mubr.bf16.mxu0 %v3288_v35  ;;  %v85_v13 = vld [vmem:[#allocation2 + $0x20] sm:$0xff] }
  0x91   :  { %1464 = vmatpush1.bf16.msra.mxu1 %v2756_v15  ;;  %v2851_v15 = vld [vmem:[#allocation5 + $0x604] ss:$16 sps:$4 sm:$0xff]  }
  0x92   :  { %1382 = vmatpush1.bf16.msra.mxu0 %v2753_v14  ;;  %1465 = vmatprep.subr.bf16.mxu1 %v2764_v17  ;;  %v2845_v14 = vld [vmem:[#allocation5 + $0x20c] ss:$16 sps:$4 sm:$0xff]   ;;  %v2843_v17 = vld [vmem:[#allocation5 + $0x208] ss:$16 sps:$4 sm:$0xff]  }
  0x93   :  { %1383 = vmatprep.subr.bf16.mxu0 %v2761_v16  ;;  %v3291_v16 = vpack.c.bf16 %v85_v13, %v85_v13  ;;  %v2977_v13 = vld [vmem:[#allocation7 + $0xa4] ss:$8 sps:$4 sm:$0xff]  }
  0x95   :  { %1466 = vmatpush1.bf16.msra.mxu1 %v2762_v19  ;;  %v2848_v19 = vld [vmem:[#allocation5 + $0x22c] ss:$16 sps:$4 sm:$0xff]  }
  0x96   :  { %1384 = vmatpush1.bf16.msra.mxu0 %v2759_v18  ;;  %1467 = vmatprep.subr.bf16.mxu1 %v2770_v21  ;;  %v2849_v18 = vld [vmem:[#allocation5 + $0x600] ss:$16 sps:$4 sm:$0xff]   ;;  %v2846_v21 = vld [vmem:[#allocation5 + $0x228] ss:$16 sps:$4 sm:$0xff]  }
  0x97   :  { %1385 = vmatprep.subr.bf16.mxu0 %v2767_v20  ;;  %v2941_v20 = vld [vmem:[#allocation5 + $0x60c] ss:$16 sps:$4 sm:$0xff]  }
  0x99   :  { %1468 = vmatpush1.bf16.msra.mxu1 %v2768_v23  ;;  %v3185_v23 = vmov 0  }
  0x9a   :  { %1386 = vmatpush1.bf16.msra.mxu0 %v2765_v22  ;;  %1469 = vmatprep.subr.bf16.mxu1 %v2776_v25  ;;  %v2854_v22 = vld [vmem:[#allocation5 + $0x24c] ss:$16 sps:$4 sm:$0xff]  }
  0x9b   :  { %1387 = vmatprep.subr.bf16.mxu0 %v2773_v24  ;;  %v2852_v24 = vld [vmem:[#allocation5 + $0x248] ss:$16 sps:$4 sm:$0xff]  }
  0x9c   :  { %v87_v25 = vld [vmem:[#allocation2 + $0x30] sm:$0xff] }
  0x9d   :  { %1470 = vmatpush1.bf16.msra.mxu1 %v2774_v27  ;;  %v2855_v27 = vld [vmem:[#allocation5 + $0x268] ss:$16 sps:$4 sm:$0xff]  }
  0x9e   :  { %1388 = vmatpush1.bf16.msra.mxu0 %v2771_v26  ;;  %1471 = vmatprep.subr.bf16.mxu1 %v2782_v29  ;;  %v2857_v26 = vld [vmem:[#allocation5 + $0x26c] ss:$16 sps:$4 sm:$0xff]   ;;  %v94_v29 = vpack.c.bf16 %v87_v25, %v87_v25  ;;  %v2981_v25 = vld [vmem:[#allocation7 + $0xc0] ss:$8 sps:$4 sm:$0xff]  }
  0x9f   :  { %1389 = vmatprep.subr.bf16.mxu0 %v2779_v28  ;;  %v2939_v28 = vld [vmem:[#allocation5 + $0x608] ss:$16 sps:$4 sm:$0xff]  }
  0xa1   :  { %1472 = vmatpush1.bf16.msra.mxu1 %v2780_v31  ;;  %v2863_v31 = vld [vmem:[#allocation5 + $0x2ac] ss:$16 sps:$4 sm:$0xff]  }
  0xa2   :  { %1390 = vmatpush1.bf16.msra.mxu0 %v2777_v30  ;;  %1473 = vmatprep.subr.bf16.mxu1 %v2788_v33  ;;  %v2858_v30 = vld [vmem:[#allocation5 + $0x288] ss:$16 sps:$4 sm:$0xff]  }
  0xa3   :  { %1391 = vmatprep.subr.bf16.mxu0 %v2785_v32  ;;  %v2861_v32 = vld [vmem:[#allocation5 + $0x2a8] ss:$16 sps:$4 sm:$0xff]  }
  0xa4   :  { %v2864_v33 = vld [vmem:[#allocation5 + $0x2c8] ss:$16 sps:$4 sm:$0xff]  }
  0xa5   :  { %1474 = vmatpush1.bf16.msra.mxu1 %v2786_v37  ;;  %v2947_v37 = vld [vmem:[#allocation7 + $0x4] ss:$8 sps:$4 sm:$0xff]  }
  0xa6   :  { %1392 = vmatpush1.bf16.msra.mxu0 %v2783_v36  ;;  %1475 = vmatprep.subr.bf16.mxu1 %v2794_v39  ;;  %v2945_v36 = vld [vmem:[#allocation7] ss:$8 sps:$4 sm:$0xff]  }
  0xa7   :  { %1393 = vmatprep.subr.bf16.mxu0 %v2791_v38  ;;  %v2950_v38 = vld [vmem:[#allocation7 + $0x14] ss:$8 sps:$4 sm:$0xff]   ;;  %v2867_v39 = vld [vmem:[#allocation5 + $0x2e8] ss:$16 sps:$4 sm:$0xff]  }
  0xa9   :  { %1476 = vmatpush1.bf16.msra.mxu1 %v2792_v41  ;;  %v2872_v41 = vld [vmem:[#allocation5 + $0x30c] ss:$16 sps:$4 sm:$0xff]  }
  0xaa   :  { %1394 = vmatpush1.bf16.msra.mxu0 %v2789_v40  ;;  %1477 = vmatprep.subr.bf16.mxu1 %v2800_v43  ;;  %v2948_v40 = vld [vmem:[#allocation7 + $0x10] ss:$8 sps:$4 sm:$0xff]  }
  0xab   :  { %1395 = vmatprep.subr.bf16.mxu0 %v2797_v42  ;;  %v2953_v42 = vld [vmem:[#allocation7 + $0x24] ss:$8 sps:$4 sm:$0xff]   ;;  %v2870_v43 = vld [vmem:[#allocation5 + $0x308] ss:$16 sps:$4 sm:$0xff]  }
  0xad   :  { %1478 = vmatpush1.bf16.msra.mxu1 %v2798_v45  ;;  %v2875_v45 = vld [vmem:[#allocation5 + $0x32c] ss:$16 sps:$4 sm:$0xff]  }
  0xae   :  { %1396 = vmatpush1.bf16.msra.mxu0 %v2795_v44  ;;  %1479 = vmatprep.subr.bf16.mxu1 %v2806_v47  ;;  %v2951_v44 = vld [vmem:[#allocation7 + $0x20] ss:$8 sps:$4 sm:$0xff]  }
  0xaf   :  { %1397 = vmatprep.subr.bf16.mxu0 %v2803_v46  ;;  %v2956_v46 = vld [vmem:[#allocation7 + $0x34] ss:$8 sps:$4 sm:$0xff]   ;;  %v2873_v47 = vld [vmem:[#allocation5 + $0x328] ss:$16 sps:$4 sm:$0xff]  }
  0xb1   :  { %1480 = vmatpush1.bf16.msra.mxu1 %v2804_v49  ;;  %v2878_v49 = vld [vmem:[#allocation5 + $0x34c] ss:$16 sps:$4 sm:$0xff]  }
  0xb2   :  { %1398 = vmatpush1.bf16.msra.mxu0 %v2801_v48  ;;  %1481 = vmatprep.subr.bf16.mxu1 %v2812_v51  ;;  %v2954_v48 = vld [vmem:[#allocation7 + $0x30] ss:$8 sps:$4 sm:$0xff]  }
  0xb3   :  { %1399 = vmatprep.subr.bf16.mxu0 %v2809_v50  ;;  %v2959_v50 = vld [vmem:[#allocation7 + $0x44] ss:$8 sps:$4 sm:$0xff]   ;;  %v2876_v51 = vld [vmem:[#allocation5 + $0x348] ss:$16 sps:$4 sm:$0xff]  }
  0xb5   :  { %1482 = vmatpush1.bf16.msra.mxu1 %v2810_v54  ;;  %v2881_v54 = vld [vmem:[#allocation5 + $0x36c] ss:$16 sps:$4 sm:$0xff]  }
  0xb6   :  { %1400 = vmatpush1.bf16.msra.mxu0 %v2807_v53  ;;  %1483 = vmatprep.subr.bf16.mxu1 %v2818_v56  ;;  %v2957_v53 = vld [vmem:[#allocation7 + $0x40] ss:$8 sps:$4 sm:$0xff]  }
  0xb7   :  { %1401 = vmatprep.subr.bf16.mxu0 %v2815_v55  ;;  %v2962_v55 = vld [vmem:[#allocation7 + $0x54] ss:$8 sps:$4 sm:$0xff]   ;;  %v2879_v56 = vld [vmem:[#allocation5 + $0x368] ss:$16 sps:$4 sm:$0xff]  }
  0xb9   :  { %1484 = vmatpush1.bf16.msra.mxu1 %v2816_v58  ;;  %v2884_v58 = vld [vmem:[#allocation5 + $0x38c] ss:$16 sps:$4 sm:$0xff]  }
  0xba   :  { %1402 = vmatpush1.bf16.msra.mxu0 %v2813_v57  ;;  %1485 = vmatprep.subr.bf16.mxu1 %v2824_v60  ;;  %v2960_v57 = vld [vmem:[#allocation7 + $0x50] ss:$8 sps:$4 sm:$0xff]  }
  0xbb   :  { %1403 = vmatprep.subr.bf16.mxu0 %v2821_v59  ;;  %v2965_v59 = vld [vmem:[#allocation7 + $0x64] ss:$8 sps:$4 sm:$0xff]   ;;  %v2882_v60 = vld [vmem:[#allocation5 + $0x388] ss:$16 sps:$4 sm:$0xff]  }
  0xbd   :  { %1486 = vmatpush1.bf16.msra.mxu1 %v2822_v62  ;;  %v2887_v62 = vld [vmem:[#allocation5 + $0x3ac] ss:$16 sps:$4 sm:$0xff]  }
  0xbe   :  { %1404 = vmatpush1.bf16.msra.mxu0 %v2819_v61  ;;  %1487 = vmatprep.subr.bf16.mxu1 %v2830_v0  ;;  %v2963_v61 = vld [vmem:[#allocation7 + $0x60] ss:$8 sps:$4 sm:$0xff]  }
  0xbf   :  { %1405 = vmatprep.subr.bf16.mxu0 %v2827_v63  ;;  %v2968_v63 = vld [vmem:[#allocation7 + $0x74] ss:$8 sps:$4 sm:$0xff]   ;;  %v2885_v0 = vld [vmem:[#allocation5 + $0x3a8] ss:$16 sps:$4 sm:$0xff]  }
  0xc1   :  { %1488 = vmatpush1.bf16.msra.mxu1 %v2828_v2  ;;  %v2890_v2 = vld [vmem:[#allocation5 + $0x3cc] ss:$16 sps:$4 sm:$0xff]  }
  0xc2   :  { %1406 = vmatpush1.bf16.msra.mxu0 %v2825_v1  ;;  %1489 = vmatprep.subr.bf16.mxu1 %v2836_v4  ;;  %v2966_v1 = vld [vmem:[#allocation7 + $0x70] ss:$8 sps:$4 sm:$0xff]  }
  0xc3   :  { %1407 = vmatprep.subr.bf16.mxu0 %v2833_v3  ;;  %v2971_v3 = vld [vmem:[#allocation7 + $0x84] ss:$8 sps:$4 sm:$0xff]   ;;  %v2888_v4 = vld [vmem:[#allocation5 + $0x3c8] ss:$16 sps:$4 sm:$0xff]  }
  0xc5   :  { %1490 = vmatpush1.bf16.msra.mxu1 %v2834_v6  ;;  %v2893_v6 = vld [vmem:[#allocation5 + $0x3ec] ss:$16 sps:$4 sm:$0xff]  }
  0xc6   :  { %1408 = vmatpush1.bf16.msra.mxu0 %v2831_v5  ;;  %1491 = vmatprep.subr.bf16.mxu1 %v2842_v9  ;;  %v2969_v5 = vld [vmem:[#allocation7 + $0x80] ss:$8 sps:$4 sm:$0xff]  }
  0xc7   :  { %1409 = vmatprep.subr.bf16.mxu0 %v2839_v7  ;;  %v2974_v7 = vld [vmem:[#allocation7 + $0x94] ss:$8 sps:$4 sm:$0xff]   ;;  %v2891_v9 = vld [vmem:[#allocation5 + $0x3e8] ss:$16 sps:$4 sm:$0xff]  }
  0xc9   :  { %1492 = vmatpush1.bf16.msra.mxu1 %v2840_v12  ;;  %v2896_v12 = vld [vmem:[#allocation5 + $0x40c] ss:$16 sps:$4 sm:$0xff]  }
  0xca   :  { %1410 = vmatpush1.bf16.msra.mxu0 %v2837_v10  ;;  %1502 = vmatprep.subr.bf16.mxu1 %v2845_v14  ;;  %v2972_v10 = vld [vmem:[#allocation7 + $0x90] ss:$8 sps:$4 sm:$0xff]  }
  0xcb   :  { %1420 = vmatprep.subr.bf16.mxu0 %v2851_v15  ;;  %v2894_v14 = vld [vmem:[#allocation5 + $0x408] ss:$16 sps:$4 sm:$0xff]   ;;  %v2899_v15 = vld [vmem:[#allocation5 + $0x42c] ss:$16 sps:$4 sm:$0xff]  }
  0xcc   :  { %1494 = vmatmul.mubr.bf16.vlgmr.msra.gmra.mrb[4].mxu1 %v3281_v8  ;;  %v2860_v8 = vld [vmem:[#allocation5 + $0x28c] ss:$16 sps:$4 sm:$0xff]  }
  0xcd   :  { %1412 = vmatmul.mubr.bf16.vlgmr.msra.gmra.mrb[0].mxu0 %v3291_v16  ;;  %1503 = vmatpush1.bf16.msra.mxu1 %v2843_v17  ;;  %v2975_v17 = vld [vmem:[#allocation7 + $0xa0] ss:$8 sps:$4 sm:$0xff]  }
  0xce   :  { %1421 = vmatpush1.bf16.msra.mxu0 %v2849_v18  ;;  %1504 = vmatprep.subr.bf16.mxu1 %v2848_v19  ;;  %v2980_v18 = vld [vmem:[#allocation7 + $0xb4] ss:$8 sps:$4 sm:$0xff]   ;;  %v2897_v19 = vld [vmem:[#allocation5 + $0x428] ss:$16 sps:$4 sm:$0xff]  }
  0xcf   :  { %1452 = vmatprep.mubr.bf16.mxu0 %v3185_v23  ;;  %1534 = vmatprep.mubr.bf16.mxu1 %v3277_v52  ;;  %v2866_v52 = vld [vmem:[#allocation5 + $0x2cc] ss:$16 sps:$4 sm:$0xff]  }
  0xd0   :  { %1584 = vmatprep.subr.bf16.mxu0 %v2941_v20  ;;  %v2902_v20 = vld [vmem:[#allocation5 + $0x44c] ss:$16 sps:$4 sm:$0xff]  }
  0xd1   :  { %1505 = vmatpush1.bf16.msra.mxu1 %v2846_v21  ;;  %v2978_v21 = vld [vmem:[#allocation7 + $0xb0] ss:$8 sps:$4 sm:$0xff]  }
  0xd2   :  { %1506 = vmatprep.subr.bf16.mxu1 %v2854_v22  ;;  %v2983_v22 = vld [vmem:[#allocation7 + $0xc4] ss:$8 sps:$4 sm:$0xff]  }
  0xd5   :  { %1507 = vmatpush1.bf16.msra.mxu1 %v2852_v24  ;;  %v2905_v24 = vld [vmem:[#allocation5 + $0x46c] ss:$16 sps:$4 sm:$0xff]  }
  0xd6   :  { %1508 = vmatprep.subr.bf16.mxu1 %v2857_v26  ;;  %v2986_v26 = vld [vmem:[#allocation7 + $0xd4] ss:$8 sps:$4 sm:$0xff]  }
  0xd9   :  { %2504 = vmatmul.mubr.msk.bf16.vlgmr.msra.gmra.mrb[0].mxu0 %vm1293_vm0, %v94_v29  ;;  %1509 = vmatpush1.bf16.msra.mxu1 %v2855_v27  ;;  %v2908_v27 = vld [vmem:[#allocation5 + $0x48c] ss:$16 sps:$4 sm:$0xff]  }
  0xda   :  { %1585 = vmatpush1.bf16.msra.mxu0 %v2939_v28  ;;  %1510 = vmatprep.subr.bf16.mxu1 %v2860_v8  ;;  %v2906_v28 = vld [vmem:[#allocation5 + $0x488] ss:$16 sps:$4 sm:$0xff]  }
  0xdb   :  { %1616 = vmatprep.mubr.bf16.mxu0 %v3185_v23  ;;  %2029 = vmatprep.subr.bf16.mxu0 %v2947_v37  ;;  %v2900_v23 = vld [vmem:[#allocation5 + $0x448] ss:$16 sps:$4 sm:$0xff]   ;;  %v2989_v37 = vld [vmem:[#allocation7 + $0xe4] ss:$8 sps:$4 sm:$0xff]  }
  0xdc   :  { %v2909_v8 = vld [vmem:[#allocation5 + $0x4a8] ss:$16 sps:$4 sm:$0xff]  }
  0xdd   :  { %1511 = vmatpush1.bf16.msra.mxu1 %v2858_v30  ;;  %v2914_v30 = vld [vmem:[#allocation5 + $0x4cc] ss:$16 sps:$4 sm:$0xff]  }
  0xde   :  { %1512 = vmatprep.subr.bf16.mxu1 %v2863_v31  ;;  %v2912_v31 = vld [vmem:[#allocation5 + $0x4c8] ss:$16 sps:$4 sm:$0xff]  }
  0xe1   :  { %2505 = vmatmul.mubr.msk.bf16.vlgmr.msra.gmra.mrb[4].mxu0 %vm1293_vm0, %v94_v29  ;;  %1513 = vmatpush1.bf16.msra.mxu1 %v2861_v32  ;;  %v2911_v29 = vld [vmem:[#allocation5 + $0x4ac] ss:$16 sps:$4 sm:$0xff]  }
  0xe2   :  { %1514 = vmatprep.subr.bf16.mxu1 %v2866_v52  ;;  %2030 = vmatpush1.bf16.msra.mxu0 %v2945_v36  ;;  %v2917_v32 = vld [vmem:[#allocation5 + $0x4ec] ss:$16 sps:$4 sm:$0xff]   ;;  %v2915_v52 = vld [vmem:[#allocation5 + $0x4e8] ss:$16 sps:$4 sm:$0xff]  }
  0xe3   :  { %2031 = vmatprep.subr.bf16.mxu0 %v2950_v38  ;;  %v2923_v36 = vld [vmem:[#allocation5 + $0x52c] ss:$16 sps:$4 sm:$0xff]   ;;  %v2987_v38 = vld [vmem:[#allocation7 + $0xe0] ss:$8 sps:$4 sm:$0xff]  }
  0xe5   :  { %1515 = vmatpush1.bf16.msra.mxu1 %v2864_v33  ;;  %v2920_v33 = vld [vmem:[#allocation5 + $0x50c] ss:$16 sps:$4 sm:$0xff]  }
  0xe6   :  { %1516 = vmatprep.subr.bf16.mxu1 %v2869_v34  ;;  %2032 = vmatpush1.bf16.msra.mxu0 %v2948_v40  ;;  %v2918_v34 = vld [vmem:[#allocation5 + $0x508] ss:$16 sps:$4 sm:$0xff]   ;;  %v2926_v40 = vld [vmem:[#allocation5 + $0x54c] ss:$16 sps:$4 sm:$0xff]  }
  0xe7   :  { %2033 = vmatprep.subr.bf16.mxu0 %v2953_v42  ;;  %v2990_v42 = vld [vmem:[#allocation7 + $0xf0] ss:$8 sps:$4 sm:$0xff]  }
  0xe9   :  { %1517 = vmatpush1.bf16.msra.mxu1 %v2867_v39  ;;  %v2921_v39 = vld [vmem:[#allocation5 + $0x528] ss:$16 sps:$4 sm:$0xff]  }
  0xea   :  { %1518 = vmatprep.subr.bf16.mxu1 %v2872_v41  ;;  %2034 = vmatpush1.bf16.msra.mxu0 %v2951_v44  ;;  %v2992_v41 = vld [vmem:[#allocation7 + $0xf4] ss:$8 sps:$4 sm:$0xff]  }
  0xeb   :  { %2035 = vmatprep.subr.bf16.mxu0 %v2956_v46  ;;  %v2929_v44 = vld [vmem:[#allocation5 + $0x56c] ss:$16 sps:$4 sm:$0xff]   ;;  %v2927_v46 = vld [vmem:[#allocation5 + $0x568] ss:$16 sps:$4 sm:$0xff]  }
  0xed   :  { %1519 = vmatpush1.bf16.msra.mxu1 %v2870_v43  ;;  %v2924_v43 = vld [vmem:[#allocation5 + $0x548] ss:$16 sps:$4 sm:$0xff]  }
  0xee   :  { %1520 = vmatprep.subr.bf16.mxu1 %v2875_v45  ;;  %2036 = vmatpush1.bf16.msra.mxu0 %v2954_v48  ;;  %v2995_v45 = vld [vmem:[#allocation7 + $0x104] ss:$8 sps:$4 sm:$0xff]   ;;  %v2930_v48 = vld [vmem:[#allocation5 + $0x588] ss:$16 sps:$4 sm:$0xff]  }
  0xef   :  { %2037 = vmatprep.subr.bf16.mxu0 %v2959_v50  ;;  %v2933_v50 = vld [vmem:[#allocation5 + $0x5a8] ss:$16 sps:$4 sm:$0xff]  }
  0xf1   :  { %1521 = vmatpush1.bf16.msra.mxu1 %v2873_v47  ;;  %v2932_v47 = vld [vmem:[#allocation5 + $0x58c] ss:$16 sps:$4 sm:$0xff]  }
  0xf2   :  { %1522 = vmatprep.subr.bf16.mxu1 %v2878_v49  ;;  %2038 = vmatpush1.bf16.msra.mxu0 %v2957_v53  ;;  %v2935_v49 = vld [vmem:[#allocation5 + $0x5ac] ss:$16 sps:$4 sm:$0xff]   ;;  %v2936_v53 = vld [vmem:[#allocation5 + $0x5c8] ss:$16 sps:$4 sm:$0xff]  }
  0xf3   :  { %2039 = vmatprep.subr.bf16.mxu0 %v2962_v55  ;;  %v2942_v55 = vld [vmem:[#allocation5 + $0x5e8] ss:$16 sps:$4 sm:$0xff]  }
  0xf5   :  { %1523 = vmatpush1.bf16.msra.mxu1 %v2876_v51  ;;  %v2938_v51 = vld [vmem:[#allocation5 + $0x5cc] ss:$16 sps:$4 sm:$0xff]  }
  0xf6   :  { %1524 = vmatprep.subr.bf16.mxu1 %v2881_v54  ;;  %2040 = vmatpush1.bf16.msra.mxu0 %v2960_v57  ;;  %v2944_v54 = vld [vmem:[#allocation5 + $0x5ec] ss:$16 sps:$4 sm:$0xff]  }
  0xf7   :  { %2041 = vmatprep.subr.bf16.mxu0 %v2965_v59 }
  0xf9   :  { %1525 = vmatpush1.bf16.msra.mxu1 %v2879_v56 }
  0xfa   :  { %1526 = vmatprep.subr.bf16.mxu1 %v2884_v58  ;;  %2042 = vmatpush1.bf16.msra.mxu0 %v2963_v61 }
  0xfb   :  { %2043 = vmatprep.subr.bf16.mxu0 %v2968_v63  ;;  %v3305_v63 = vld [vmem:[%s3348_s2] sm:$0xf] }
  0xfd   :  { %1527 = vmatpush1.bf16.msra.mxu1 %v2882_v60  ;;  %v293_v60 = vlaneseq }
  0xfe   :  { %1528 = vmatprep.subr.bf16.mxu1 %v2887_v62  ;;  %2044 = vmatpush1.bf16.msra.mxu0 %v2966_v1 }
  0xff   :  { %2045 = vmatprep.subr.bf16.mxu0 %v2971_v3  ;;  %v3299_v61 = vshrl.u32 %v293_v60, 7  ;;  %v3041_v3 = vld [vmem:[#allocation8 + $0x40] sm:$0xff]   ;;  %v3040_v60 = vld [vmem:[#allocation7 + $0x1f4] ss:$8 sps:$4 sm:$0xff]  }
 0x101   :  { %1529 = vmatpush1.bf16.msra.mxu1 %v2885_v0  ;;  %v295_v62 = vsub.s32 0, %v3299_v61  ;;  %v299_v0 = vsub.s32 1, %v3299_v61 }
 0x102   :  { %1530 = vmatprep.subr.bf16.mxu1 %v2890_v2  ;;  %2046 = vmatpush1.bf16.msra.mxu0 %v2969_v5  ;;  %v3043_v5 = vld [vmem:[#allocation8 + $0x48] sm:$0xff]  }
 0x103   :  { %2047 = vmatprep.subr.bf16.mxu0 %v2974_v7  ;;  %v300_v1 = vrot.slane %v3305_v63, %v299_v0 }
 0x105   :  { %1531 = vmatpush1.bf16.msra.mxu1 %v2888_v4  ;;  %v3042_v4 = vld [vmem:[#allocation8] sm:$0xff]  }
 0x106   :  { %1532 = vmatprep.subr.bf16.mxu1 %v2893_v6  ;;  %2048 = vmatpush1.bf16.msra.mxu0 %v2972_v10 }
 0x107   :  { %2049 = vmatprep.subr.bf16.mxu0 %v2977_v13 }
 0x109   :  { %1533 = vmatpush1.bf16.msra.mxu1 %v2891_v9 }
 0x10a   :  { %1543 = vmatprep.subr.bf16.mxu1 %v2896_v12  ;;  %2050 = vmatpush1.bf16.msra.mxu0 %v2975_v17 }
 0x10b   :  { %2051 = vmatprep.subr.bf16.mxu0 %v2980_v18  ;;  %v3045_v18 = vld [vmem:[#allocation8 + $0x50] sm:$0xff]  }
 0x10c   :  { %1535 = vmatmul.mubr.bf16.vlgmr.msra.gmra.mrb[4].mxu1 %v3283_v11  ;;  %v2903_v11 = vld [vmem:[#allocation5 + $0x468] ss:$16 sps:$4 sm:$0xff]  }
 0x10d   :  { %1544 = vmatpush1.bf16.msra.mxu1 %v2894_v14  ;;  %1575 = vmatprep.mubr.bf16.mxu1 %v3288_v35  ;;  %v2984_v35 = vld [vmem:[#allocation7 + $0xd0] ss:$8 sps:$4 sm:$0xff]   ;;  %v3044_v14 = vld [vmem:[#allocation8 + $0x8] sm:$0xff]  }
 0x10e   :  { %1545 = vmatprep.subr.bf16.mxu1 %v2899_v15  ;;  %2052 = vmatpush1.bf16.msra.mxu0 %v2978_v21  ;;  %v2993_v21 = vld [vmem:[#allocation7 + $0x100] ss:$8 sps:$4 sm:$0xff]  }
 0x10f   :  { %2053 = vmatprep.subr.bf16.mxu0 %v2983_v22  ;;  %v3046_v22 = vld [vmem:[#allocation8 + $0x10] sm:$0xff]  }
 0x111   :  { %1546 = vmatpush1.bf16.msra.mxu1 %v2897_v19 }
 0x112   :  { %1547 = vmatprep.subr.bf16.mxu1 %v2902_v20  ;;  %2054 = vmatpush1.bf16.msra.mxu0 %v2981_v25  ;;  %v3047_v25 = vld [vmem:[#allocation8 + $0x58] sm:$0xff]  }
 0x113   :  { %2055 = vmatprep.subr.bf16.mxu0 %v2986_v26 }
 0x115   :  { %1548 = vmatpush1.bf16.msra.mxu1 %v2900_v23 }
 0x116   :  { %1549 = vmatprep.subr.bf16.mxu1 %v2905_v24  ;;  %2056 = vmatpush1.bf16.msra.mxu0 %v2984_v35  ;;  %v2998_v24 = vld [vmem:[#allocation7 + $0x114] ss:$8 sps:$4 sm:$0xff]  }
 0x117   :  { %2057 = vmatprep.subr.bf16.mxu0 %v2989_v37  ;;  %v3007_v37 = vld [vmem:[#allocation7 + $0x144] ss:$8 sps:$4 sm:$0xff]  }
 0x119   :  { %1550 = vmatpush1.bf16.msra.mxu1 %v2903_v11 }
 0x11a   :  { %1551 = vmatprep.subr.bf16.mxu1 %v2908_v27  ;;  %2058 = vmatpush1.bf16.msra.mxu0 %v2987_v38  ;;  %v2996_v27 = vld [vmem:[#allocation7 + $0x110] ss:$8 sps:$4 sm:$0xff]   ;;  %v3005_v38 = vld [vmem:[#allocation7 + $0x140] ss:$8 sps:$4 sm:$0xff]  }
 0x11b   :  { %2059 = vmatprep.subr.bf16.mxu0 %v2992_v41  ;;  %v3013_v41 = vld [vmem:[#allocation7 + $0x164] ss:$8 sps:$4 sm:$0xff]  }
 0x11d   :  { %1552 = vmatpush1.bf16.msra.mxu1 %v2906_v28  ;;  %v3048_v28 = vld [vmem:[#allocation8 + $0x18] sm:$0xff]  }
 0x11e   :  { %1553 = vmatprep.subr.bf16.mxu1 %v2911_v29  ;;  %2060 = vmatpush1.bf16.msra.mxu0 %v2990_v42  ;;  %v3001_v29 = vld [vmem:[#allocation7 + $0x124] ss:$8 sps:$4 sm:$0xff]   ;;  %v3011_v42 = vld [vmem:[#allocation7 + $0x160] ss:$8 sps:$4 sm:$0xff]  }
 0x11f   :  { %2070 = vmatprep.subr.bf16.mxu0 %v2995_v45  ;;  %v3019_v45 = vld [vmem:[#allocation7 + $0x184] ss:$8 sps:$4 sm:$0xff]  }
 0x121   :  { %1554 = vmatpush1.bf16.msra.mxu1 %v2909_v8 }
 0x122   :  { %1555 = vmatprep.subr.bf16.mxu1 %v2914_v30  ;;  %v3049_v30 = vld [vmem:[#allocation8 + $0x60] sm:$0xff]  }
 0x125   :  { %1556 = vmatpush1.bf16.msra.mxu1 %v2912_v31  ;;  %v2999_v31 = vld [vmem:[#allocation7 + $0x120] ss:$8 sps:$4 sm:$0xff]  }
 0x126   :  { %1557 = vmatprep.subr.bf16.mxu1 %v2917_v32  ;;  %v3050_v32 = vld [vmem:[#allocation8 + $0x20] sm:$0xff]  }
 0x129   :  { %1558 = vmatpush1.bf16.msra.mxu1 %v2915_v52  ;;  %v3004_v52 = vld [vmem:[#allocation7 + $0x134] ss:$8 sps:$4 sm:$0xff]  }
 0x12a   :  { %1559 = vmatprep.subr.bf16.mxu1 %v2920_v33  ;;  %v3051_v33 = vld [vmem:[#allocation8 + $0x68] sm:$0xff]  }
 0x12d   :  { %1560 = vmatpush1.bf16.msra.mxu1 %v2918_v34  ;;  %v3002_v34 = vld [vmem:[#allocation7 + $0x130] ss:$8 sps:$4 sm:$0xff]  }
 0x12e   :  { %1561 = vmatprep.subr.bf16.mxu1 %v2923_v36  ;;  %v3052_v36 = vld [vmem:[#allocation8 + $0x28] sm:$0xff]  }
 0x131   :  { %1562 = vmatpush1.bf16.msra.mxu1 %v2921_v39  ;;  %v3010_v39 = vld [vmem:[#allocation7 + $0x154] ss:$8 sps:$4 sm:$0xff]  }
 0x132   :  { %1563 = vmatprep.subr.bf16.mxu1 %v2926_v40  ;;  %v3008_v40 = vld [vmem:[#allocation7 + $0x150] ss:$8 sps:$4 sm:$0xff]  }
 0x135   :  { %1564 = vmatpush1.bf16.msra.mxu1 %v2924_v43  ;;  %v3016_v43 = vld [vmem:[#allocation7 + $0x174] ss:$8 sps:$4 sm:$0xff]  }
 0x136   :  { %1565 = vmatprep.subr.bf16.mxu1 %v2929_v44  ;;  %v3014_v44 = vld [vmem:[#allocation7 + $0x170] ss:$8 sps:$4 sm:$0xff]  }
 0x139   :  { %1566 = vmatpush1.bf16.msra.mxu1 %v2927_v46  ;;  %v3017_v46 = vld [vmem:[#allocation7 + $0x180] ss:$8 sps:$4 sm:$0xff]  }
 0x13a   :  { %1567 = vmatprep.subr.bf16.mxu1 %v2932_v47  ;;  %v3022_v47 = vld [vmem:[#allocation7 + $0x194] ss:$8 sps:$4 sm:$0xff]  }
 0x13d   :  { %1568 = vmatpush1.bf16.msra.mxu1 %v2930_v48  ;;  %v3020_v48 = vld [vmem:[#allocation7 + $0x190] ss:$8 sps:$4 sm:$0xff]  }
 0x13e   :  { %1569 = vmatprep.subr.bf16.mxu1 %v2935_v49  ;;  %v3025_v49 = vld [vmem:[#allocation7 + $0x1a4] ss:$8 sps:$4 sm:$0xff]  }
 0x141   :  { %1570 = vmatpush1.bf16.msra.mxu1 %v2933_v50  ;;  %v3023_v50 = vld [vmem:[#allocation7 + $0x1a0] ss:$8 sps:$4 sm:$0xff]  }
 0x142   :  { %1571 = vmatprep.subr.bf16.mxu1 %v2938_v51  ;;  %v3028_v51 = vld [vmem:[#allocation7 + $0x1b4] ss:$8 sps:$4 sm:$0xff]  }
 0x145   :  { %1572 = vmatpush1.bf16.msra.mxu1 %v2936_v53  ;;  %v3026_v53 = vld [vmem:[#allocation7 + $0x1b0] ss:$8 sps:$4 sm:$0xff]  }
 0x146   :  { %1573 = vmatprep.subr.bf16.mxu1 %v2944_v54  ;;  %v3031_v54 = vld [vmem:[#allocation7 + $0x1c4] ss:$8 sps:$4 sm:$0xff]  }
 0x149   :  { %1574 = vmatpush1.bf16.msra.mxu1 %v2942_v55  ;;  %v3029_v55 = vld [vmem:[#allocation7 + $0x1c0] ss:$8 sps:$4 sm:$0xff]  }
 0x14a   :  { %2587 = vmatprep.subr.bf16.mxu1 %v3041_v3 }
 0x14c   :  { %1576 = vmatmul.mubr.bf16.vlgmr.msra.gmra.mrb[4].mxu1 %v3291_v16  ;;  %v296_v16 = vrot.slane %v3305_v63, %v295_v62 }
 0x14d   :  { %2588 = vmatpush3.bf16.msra.mxu1 %v3042_v4 }
 0x14e   :  { %2589 = vmatprep.subr.bf16.mxu1 %v3043_v5 }
 0x151   :  { %2590 = vmatpush3.bf16.msra.mxu1 %v3044_v14 }
 0x152   :  { %2591 = vmatprep.subr.bf16.mxu1 %v3045_v18 }
 0x155   :  { %2592 = vmatpush3.bf16.msra.mxu1 %v3046_v22  ;;  %v3056_v22 = vld [vmem:[#allocation8 + $0x38] sm:$0xff]  }
 0x156   :  { %2593 = vmatprep.subr.bf16.mxu1 %v3047_v25 }
 0x159   :  { %2594 = vmatpush3.bf16.msra.mxu1 %v3048_v28 }
 0x15a   :  { %2595 = vmatprep.subr.bf16.mxu1 %v3049_v30 }
 0x15d   :  { %2596 = vmatpush3.bf16.msra.mxu1 %v3050_v32 }
 0x15e   :  { %2597 = vmatprep.subr.bf16.mxu1 %v3051_v33 }
 0x15f   :  { %v1331_v56 = vpop.f32.mrb[0].mxu1 }
 0x160   :  { %v1333_v57 = vpop.f32.mrb[1].mxu1  ;;  %v1332_v2 = vadd.f32 %v1331_v56, %v296_v16  ;;  %v3034_v56 = vld [vmem:[#allocation7 + $0x1d4] ss:$8 sps:$4 sm:$0xff]   ;;  %v3038_v16 = vld [vmem:[#allocation7 + $0x1f0] ss:$8 sps:$4 sm:$0xff]  }
 0x161   :  { %v1335_v58 = vpop.f32.mrb[2].mxu1  ;;  %v1334_v6 = vadd.f32 %v1333_v57, %v300_v1  ;;  %2598 = vmatpush3.bf16.msra.mxu1 %v3052_v36  ;;  %v3032_v57 = vld [vmem:[#allocation7 + $0x1d0] ss:$8 sps:$4 sm:$0xff]   ;;  %v303_v1 = vsub.s32 2, %v3299_v61 }
 0x162   :  { %v1336_v59 = vpop.f32.mrb[3].mxu1  ;;  %v3037_v58 = vld [vmem:[#allocation7 + $0x1e4] ss:$8 sps:$4 sm:$0xff]  }
 0x163   :  { %v3035_v59 = vld [vmem:[#allocation7 + $0x1e0] ss:$8 sps:$4 sm:$0xff]   ;;  %v304_v3 = vrot.slane %v3305_v63, %v303_v1 }
 0x1ac   :  { %v1454_v7 = vpop.f32.mrb[0].mxu0 }
 0x1ad   :  { %v2610_v9 = vadd.f32 %v1454_v7, %v1332_v2  ;;  %v1456_v10 = vpop.f32.mrb[1].mxu0  ;;  %v307_v2 = vsub.s32 3, %v3299_v61 }
 0x1ae   :  { %v2612_v12 = vadd.f32 %v1456_v10, %v1334_v6  ;;  %v1458_v13 = vpop.f32.mrb[2].mxu0 }
 0x1af   :  { %v1625_v15 = vmax.f32 %v2610_v9, 0.0  ;;  %v1459_v17 = vpop.f32.mrb[3].mxu0  ;;  %v308_v4 = vrot.slane %v3305_v63, %v307_v2  ;;  %v3055_v63 = vld [vmem:[#allocation8 + $0x78] sm:$0xff]  }
 0x1b0   :  { %v1626_v19 = vmax.f32 %v2612_v12, 0.0 }
 0x1b1   :  { %v1629_v23 = vpack.c.bf16 %v1625_v15, %v1625_v15 }
 0x1b2   :  { %v1630_v20 = vpack.c.bf16 %v1626_v19, %v1626_v19 }
 0x1b4   :  { %2061 = vmatprep.mubr.bf16.mxu0 %v1630_v20  ;;  %v3314_v26 = vpop.f32.mrb[4].mxu0  ;;  %v3053_v20 = vld [vmem:[#allocation8 + $0x70] sm:$0xff]  }
 0x1b5   :  { %2062 = vmatmul.mubr.bf16.vlgmr.msra.gmra.mrb[8].mxu0 %v1629_v23  ;;  %v3316_v11 = vpop.f32.mrb[5].mxu0  ;;  %2599 = vmatprep.subr.bf16.mxu1 %v3053_v20  ;;  %v1697_v23 = vld [vmem:[%s3350_s4] sm:$0x3] }
 0x1b6   :  { %2071 = vmatpush1.bf16.msra.mxu0 %v2993_v21  ;;  %v1622_v35 = vpop.f32.mrb[6].mxu0  ;;  %v3054_v21 = vld [vmem:[#allocation8 + $0x30] sm:$0xff]   ;;  %v1706_v25 = vrot.slane %v1697_v23, %v299_v0 }
 0x1b7   :  { %2072 = vmatprep.subr.bf16.mxu0 %v2998_v24  ;;  %v1623_v8 = vpop.f32.mrb[7].mxu0  ;;  %2600 = vmatpush3.bf16.msra.mxu1 %v3054_v21  ;;  %v1702_v24 = vrot.slane %v1697_v23, %v295_v62  ;;  %v2570_v62 = vld [vmem:[%s3352_s6] ss:$0 sm:$0xff] }
 0x1b8   :  { %2601 = vmatprep.subr.bf16.mxu1 %v3055_v63 }
 0x1ba   :  { %2073 = vmatpush1.bf16.msra.mxu0 %v2996_v27 }
 0x1bb   :  { %2074 = vmatprep.subr.bf16.mxu0 %v3001_v29  ;;  %2602 = vmatpush3.bf16.msra.mxu1 %v3056_v22 }
 0x1be   :  { %2075 = vmatpush1.bf16.msra.mxu0 %v2999_v31 }
 0x1bf   :  { %2076 = vmatprep.subr.bf16.mxu0 %v3004_v52 }
 0x1c2   :  { %2077 = vmatpush1.bf16.msra.mxu0 %v3002_v34 }
 0x1c3   :  { %2078 = vmatprep.subr.bf16.mxu0 %v3007_v37 }
 0x1c6   :  { %2079 = vmatpush1.bf16.msra.mxu0 %v3005_v38 }
 0x1c7   :  { %2080 = vmatprep.subr.bf16.mxu0 %v3010_v39 }
 0x1ca   :  { %2081 = vmatpush1.bf16.msra.mxu0 %v3008_v40 }
 0x1cb   :  { %2082 = vmatprep.subr.bf16.mxu0 %v3013_v41 }
 0x1ce   :  { %2083 = vmatpush1.bf16.msra.mxu0 %v3011_v42 }
 0x1cf   :  { %2084 = vmatprep.subr.bf16.mxu0 %v3016_v43 }
 0x1d2   :  { %2085 = vmatpush1.bf16.msra.mxu0 %v3014_v44 }
 0x1d3   :  { %2086 = vmatprep.subr.bf16.mxu0 %v3019_v45 }
 0x1d6   :  { %2087 = vmatpush1.bf16.msra.mxu0 %v3017_v46 }
 0x1d7   :  { %2088 = vmatprep.subr.bf16.mxu0 %v3022_v47 }
 0x1da   :  { %2089 = vmatpush1.bf16.msra.mxu0 %v3020_v48 }
 0x1db   :  { %2090 = vmatprep.subr.bf16.mxu0 %v3025_v49 }
 0x1de   :  { %2091 = vmatpush1.bf16.msra.mxu0 %v3023_v50 }
 0x1df   :  { %2092 = vmatprep.subr.bf16.mxu0 %v3028_v51 }
 0x1e2   :  { %2093 = vmatpush1.bf16.msra.mxu0 %v3026_v53 }
 0x1e3   :  { %2094 = vmatprep.subr.bf16.mxu0 %v3031_v54 }
 0x1e6   :  { %2095 = vmatpush1.bf16.msra.mxu0 %v3029_v55 }
 0x1e7   :  { %2096 = vmatprep.subr.bf16.mxu0 %v3034_v56 }
 0x1ea   :  { %2097 = vmatpush1.bf16.msra.mxu0 %v3032_v57 }
 0x1eb   :  { %2098 = vmatprep.subr.bf16.mxu0 %v3037_v58 }
 0x1ee   :  { %2099 = vmatpush1.bf16.msra.mxu0 %v3035_v59 }
 0x1ef   :  { %2100 = vmatprep.subr.bf16.mxu0 %v3040_v60 }
 0x1f2   :  { %2101 = vmatpush1.bf16.msra.mxu0 %v3038_v16 }
 0x21f   :  { %v1577_v5 = vpop.f32.mrb[4].mxu1 }
 0x220   :  { %v2613_v6 = vadd.f32 %v1577_v5, %v304_v3  ;;  %v1579_v7 = vpop.f32.mrb[5].mxu1 }
 0x221   :  { %v2615_v9 = vadd.f32 %v1579_v7, %v308_v4  ;;  %v1581_v10 = vpop.f32.mrb[6].mxu1 }
 0x222   :  { %v2614_v12 = vadd.f32 %v2613_v6, %v3314_v26  ;;  %v1582_v13 = vpop.f32.mrb[7].mxu1 }
 0x223   :  { %v2616_v14 = vadd.f32 %v2615_v9, %v3316_v11 }
 0x224   :  { %v1627_v15 = vmax.f32 %v2614_v12, 0.0 }
 0x225   :  { %v1628_v17 = vmax.f32 %v2616_v14, 0.0 }
 0x226   :  { %v1631_v19 = vpack.c.bf16 %v1627_v15, %v1627_v15 }
 0x227   :  { %v1632_v18 = vpack.c.bf16 %v1628_v17, %v1628_v17 }
 0x229   :  { %2102 = vmatprep.mubr.bf16.mxu0 %v1632_v18 }
 0x22a   :  { %2103 = vmatmul.mubr.bf16.vlgmr.msra.gmra.mrb[8].mxu0 %v1631_v19 }
 0x2fd   :  { %v2104_v26 = vpop.f32.mrb[8].mxu0 }
 0x2fe   :  { %v2617_v11 = vadd.f32 %v2104_v26, %v1702_v24  ;;  %v2106_v27 = vpop.f32.mrb[9].mxu0 }
 0x2ff   :  { %v2618_v35 = vadd.f32 %v2106_v27, %v1706_v25  ;;  %v2108_v28 = vpop.f32.mrb[10].mxu0 }
 0x300   :  { %v2111_v29 = vmax.f32 %v2617_v11, 0.0  ;;  %v2109_v8 = vpop.f32.mrb[11].mxu0 }
 0x301   :  { %v2112_v30 = vmax.f32 %v2618_v35, 0.0 }
 0x302   :  { %v2113_v32 = vpack.c.bf16 %v2111_v29, %v2111_v29 }
 0x303   :  { %v2114_v31 = vpack.c.bf16 %v2112_v30, %v2112_v30 }
 0x305   :  { %2282 = vmatprep.mubr.bf16.mxu1 %v2114_v31 }
 0x306   :  { %2283 = vmatmul.mubr.bf16.vlgmr.msra.gmra.mrb[8].mxu1 %v2113_v32 }
 0x3d9   :  { %v2603_v52 = vpop.f32.mrb[8].mxu1 }
 0x3da   :  { %v2604_v33 = vpop.f32.mrb[9].mxu1 }
 0x3db   :  { %v2605_v61 = vadd.f32 %v2604_v33, %v2603_v52  ;;  %v2606_v0 = vpop.f32.mrb[10].mxu1 }
 0x3dc   :  { %v2607_v34 = vpop.f32.mrb[11].mxu1 }
 0x3dd   :  { %v2285_v36 = vadd.f32 %v2605_v61, %v2570_v62 }
 0x3df   :  { %2290 = vst [vmem:[#allocation10] sm:$0xff] %v2285_v36 }
 0x3e0   :  { %3156 = shalt.err (!%p3153_p8)
}
 0x3e1   :  { %s3157_s6 = scalar_lea.hbm %s3353_s7, 128 }
 0x3e2   :  { %p3158_p9 = scmp.ne.s32.totalorder %s3353_s7, %s3157_s6  ;;  %p3161_p10 = scmp.lt.u32.totalorder %s3157_s6, %s3353_s7 }
 0x3e4   :  { %p3163_p11 = pnand %p3161_p10, %p3158_p9 }
 0x3e6   :  { %3166 = shalt.err (!%p3163_p11)
}
 0x3e7   :  { %2300 = dma.vmem_to_hbm [thread:$0]  %s2298_s9, 128, %s3353_s7, [#allocation4]  }
 0x3e8   :  { %3173 = dma.done.wait [#allocation4], 128  }
 0x3e9   :  { %3174 = vsyncadd [#allocation4], 4294967168 }
 0x3ea   :  { %2304 = vsyncpa [#allocation3], 1 }
 0x3eb   :  { %2305 = vsyncpa [#allocation6], 1 }
 0x3ec   :  { %2306 = vsyncpa [#allocation9], 1 }
 0x3ed   :  { %2307 = vsyncpa [#allocation4], 1 }

</bundles_post_ra>
